<compile_context>
chip_gen: v7x
topology: tpu7x:2x2x1
jax: 0.10.0
libtpu: 0.0.40
codegen_flags: <defaults>
</compile_context>

<pallas_src>
import jax
import jax.numpy as jnp
from jax.experimental import pallas as pl
from jax.experimental.pallas import tpu as pltpu

EPS = 1e-5


# ----------------------------- fused Pallas kernel -------------------------- #

def _build_fused_kernel(num_layers, n_query):
    """Fused forward: MLP stack on merged (B+N, F) rows, then NONA on the split rows."""

    def kernel(*refs):
        x_ref, xn_ref = refs[0], refs[1]
        layer_refs = refs[2:2 + 2 * num_layers]
        y_ref = refs[2 + 2 * num_layers]
        o_ref = refs[3 + 2 * num_layers]

        # Queries and neighbors share the MLP: merge once in VMEM (no host concat).
        act = jnp.concatenate([x_ref[...], xn_ref[...]], axis=0)     # (B+N, Din) f32

        for i in range(num_layers):
            w_ref = layer_refs[2 * i]                                # bf16 weights
            vec_ref = layer_refs[2 * i + 1]                          # f32 vec pack
            h = jnp.dot(act.astype(jnp.bfloat16), w_ref[...],
                        preferred_element_type=jnp.float32)          # bf16 MXU, f32 acc
            if i < num_layers - 1:
                # this layer's BN is already folded into the NEXT layer's W/b
                act = jnp.tanh(h + vec_ref[...])
            else:
                # last layer keeps its BN as an explicit per-feature scale/shift
                act = (jnp.tanh(h + vec_ref[0:1, :]) * vec_ref[1:2, :]
                       + vec_ref[2:3, :])

        xq = act[:n_query, :]                                        # (B, D) f32
        xn = act[n_query:, :]                                        # (N, D) f32

        # sim = -cdist(xq, xn, p=2) via the squared-norm expansion; norms in f32,
        # cross term on the MXU (bf16 in / f32 acc), contracting dim 1 of both
        # operands so no materialized transpose of xn.
        xq2 = jnp.sum(xq * xq, axis=1, keepdims=True)                # (B, 1)
        xn2 = jnp.sum(xn * xn, axis=1, keepdims=True)                # (N, 1)
        cross = jax.lax.dot_general(
            xq.astype(jnp.bfloat16), xn.astype(jnp.bfloat16),
            dimension_numbers=(((1,), (1,)), ((), ())),
            preferred_element_type=jnp.float32)                      # (B, N)
        d2 = jnp.maximum(xq2 + jnp.transpose(xn2) - 2.0 * cross, 0.0)
        sim = -jnp.sqrt(d2)

        # softmax over neighbors (dim=1); exact division for torch parity
        m = jnp.max(sim, axis=1, keepdims=True)
        p = jnp.exp(sim - m)
        s = p / jnp.sum(p, axis=1, keepdims=True)

        out = jnp.dot(s.astype(jnp.bfloat16), y_ref[...].astype(jnp.bfloat16),
                      preferred_element_type=jnp.float32)            # (B, C)
        o_ref[...] = jnp.clip(out, 0.0, 1.0)

    return kernel


def _full_spec(shape):
    # one block == full array (tiny shapes; single grid point)
    return pl.BlockSpec(shape, lambda: tuple(0 for _ in shape))


# --------------------------------- wrapper ---------------------------------- #

def nona_nn_forward(params, x, x_n, y_n):
    """NONA_NN.forward for task='binary', predictor='nona' (single fused kernel)."""
    B, Din = x.shape
    N = x_n.shape[0]
    C = y_n.shape[1]

    raw_layers = list(params["layers"])
    L = len(raw_layers)
    assert L >= 1, "mlp=True with at least one hidden layer expected"

    # Trace-time folding: every BN affine becomes part of the FOLLOWING Linear
    # (input BN -> layer 0, hidden BN_i -> layer i+1). Only the last layer's BN
    # survives as an explicit scale/shift.
    prev_scale = params["in_scale"].astype(jnp.float32)
    prev_shift = params["in_shift"].astype(jnp.float32)
    folded = []
    for (w, b, sc, sh) in raw_layers:
        w = w.astype(jnp.float32)
        b = b.astype(jnp.float32)
        folded.append((prev_scale[:, None] * w, prev_shift @ w + b))
        prev_scale, prev_shift = sc.astype(jnp.float32), sh.astype(jnp.float32)
    last_sc, last_sh = prev_scale, prev_shift

    in_arrays = [x.astype(jnp.float32), x_n.astype(jnp.float32)]
    in_specs = [_full_spec(x.shape), _full_spec(x_n.shape)]

    mlp_flops = 0
    tanh_count = 0
    for i, (w, b) in enumerate(folded):
        din, dout = w.shape
        mlp_flops += 2 * (B + N) * din * dout
        tanh_count += (B + N) * dout
        in_arrays.append(w.astype(jnp.bfloat16))                 # cast weights once
        in_specs.append(_full_spec(w.shape))
        if i < L - 1:
            vec = b.reshape(1, dout)                              # folded bias only
        else:
            vec = jnp.stack([b, last_sc, last_sh], axis=0)        # (3, Dout) pack
        in_arrays.append(vec.astype(jnp.float32))
        in_specs.append(_full_spec(vec.shape))

    in_arrays.append(y_n.astype(jnp.float32))                     # (N, C), no padding
    in_specs.append(_full_spec(y_n.shape))

    d_last = folded[-1][0].shape[1]
    cost = pl.CostEstimate(
        flops=mlp_flops + 2 * B * N * d_last + 2 * B * N * C,
        transcendentals=tanh_count + B * N,                       # tanh + exp
        bytes_accessed=sum(int(a.size) * a.dtype.itemsize for a in in_arrays)
        + B * C * 4,
    )

    kernel = _build_fused_kernel(num_layers=L, n_query=B)
    out = pl.pallas_call(
        kernel,
        out_shape=jax.ShapeDtypeStruct((B, C), jnp.float32),
        in_specs=in_specs,
        out_specs=_full_spec((B, C)),
        compiler_params=pltpu.CompilerParams(vmem_limit_bytes=32 * 1024 * 1024),
        cost_estimate=cost,
    )(*in_arrays)

    # x.shape != x_n.shape here, so torch.equal(x, x_n) is False -> plain branch.
    return out


# --------------------------- pure-JAX reference ------------------------------ #

def nona_nn_reference(params, x, x_n, y_n):
    def mlp(z):
        z = z * params["in_scale"] + params["in_shift"]
        for (w, b, sc, sh) in params["layers"]:
            z = jnp.tanh(z @ w + b) * sc + sh
        return z

    xq, xn = mlp(x), mlp(x_n)
    d2 = (jnp.sum(xq * xq, 1, keepdims=True) + jnp.sum(xn * xn, 1)[None, :]
          - 2.0 * xq @ xn.T)
    sim = -jnp.sqrt(jnp.maximum(d2, 0.0))
    s = jax.nn.softmax(sim, axis=1)
    return jnp.clip(s @ y_n, 0.0, 1.0)


# --------------------------------- params ----------------------------------- #

def init_params(key, input_size, hl_sizes):
    dims = [input_size] + hl_sizes

    def bn_fold(k, feat):
        k1, k2 = jax.random.split(k)
        gamma = jnp.ones((feat,), jnp.float32)
        beta = jnp.zeros((feat,), jnp.float32)
        running_mean = 0.1 * jax.random.normal(k1, (feat,), jnp.float32)
        running_var = 1.0 + 0.1 * jnp.abs(jax.random.normal(k2, (feat,), jnp.float32))
        scale = gamma / jnp.sqrt(running_var + EPS)
        shift = beta - running_mean * scale
        return scale, shift

    keys = jax.random.split(key, 1 + 3 * len(hl_sizes))
    in_scale, in_shift = bn_fold(keys[0], input_size)

    layers = []
    for i in range(len(hl_sizes)):
        kw, kb, kn = keys[1 + 3 * i], keys[2 + 3 * i], keys[3 + 3 * i]
        fan_in, fan_out = dims[i], dims[i + 1]
        bound = 1.0 / jnp.sqrt(fan_in)
        # torch Linear stores (out, in); we store the transpose (in, out)
        w = jax.random.uniform(kw, (fan_in, fan_out), jnp.float32, -bound, bound)
        b = jax.random.uniform(kb, (fan_out,), jnp.float32, -bound, bound)
        scale, shift = bn_fold(kn, fan_out)
        layers.append((w, b, scale, shift))

    return {"in_scale": in_scale, "in_shift": in_shift, "layers": layers}


# ----------------------------------- main ------------------------------------ #

if __name__ == "__main__":
    input_size = 16
    hl_sizes = [32, 32]
    B, N = 8, 16  # query batch and neighbor batch

    key = jax.random.PRNGKey(0)
    kp, kx, kxn, ky = jax.random.split(key, 4)

    params = init_params(kp, input_size, hl_sizes)
    x = jax.random.normal(kx, (B, input_size), jnp.float32)
    x_n = jax.random.normal(kxn, (N, input_size), jnp.float32)
    # binary labels for the neighbor set, shape (N, 1)
    y_n = jax.random.bernoulli(ky, 0.5, (N, 1)).astype(jnp.float32)

    out = jax.block_until_ready(nona_nn_forward(params, x, x_n, y_n))
    ref = nona_nn_reference(params, x, x_n, y_n)

    assert out.shape == (B, 1)
    assert bool(jnp.all(out >= 0.0)) and bool(jnp.all(out <= 1.0))
    # loose tolerance: kernel uses bf16 MXU operands, reference is pure f32
    assert bool(jnp.max(jnp.abs(out - ref)) < 1e-1), "mismatch vs pure-JAX reference"
    print("KERNEL_OK")
</pallas_src>

<mosaic_0001>
module attributes {stable_mosaic.version = 11 : i64} {
  func.func @kernel(%arg0: memref<8x16xf32, #tpu.memory_space<vmem>>, %arg1: memref<16x16xf32, #tpu.memory_space<vmem>>, %arg2: memref<16x32xbf16, #tpu.memory_space<vmem>>, %arg3: memref<1x32xf32, #tpu.memory_space<vmem>>, %arg4: memref<32x32xbf16, #tpu.memory_space<vmem>>, %arg5: memref<3x32xf32, #tpu.memory_space<vmem>>, %arg6: memref<16x1xf32, #tpu.memory_space<vmem>>, %arg7: memref<8x1xf32, #tpu.memory_space<vmem>>) attributes {dimension_semantics = [], scalar_prefetch = 0 : i64, scratch_operands = 0 : i64, tpu.core_type = #tpu.core_type<tc>} {
    %c0 = arith.constant 0 : index
    %c0_0 = arith.constant 0 : index
    %0 = vector.load %arg0[%c0, %c0_0] : memref<8x16xf32, #tpu.memory_space<vmem>>, vector<8x16xf32>
    %c0_1 = arith.constant 0 : index
    %c0_2 = arith.constant 0 : index
    %1 = vector.load %arg1[%c0_1, %c0_2] : memref<16x16xf32, #tpu.memory_space<vmem>>, vector<16x16xf32>
    %2 = tpu.concatenate %0, %1 in 0 : vector<8x16xf32>, vector<16x16xf32> -> vector<24x16xf32>
    %3 = arith.truncf %2 : vector<24x16xf32> to vector<24x16xbf16>
    %c0_3 = arith.constant 0 : index
    %c0_4 = arith.constant 0 : index
    %4 = vector.load %arg2[%c0_3, %c0_4] : memref<16x32xbf16, #tpu.memory_space<vmem>>, vector<16x32xbf16>
    %cst = arith.constant dense<0.000000e+00> : vector<24x32xf32>
    %5 = tpu.matmul %3, %4, %cst {dimension_numbers = #tpu.dot_dimension_numbers<[1], [0], [0], [1], [0, 0, 1, 1], [], []>} : vector<24x16xbf16>, vector<16x32xbf16>, vector<24x32xf32> -> vector<24x32xf32>
    %c0_5 = arith.constant 0 : index
    %c0_6 = arith.constant 0 : index
    %6 = vector.load %arg3[%c0_5, %c0_6] : memref<1x32xf32, #tpu.memory_space<vmem>>, vector<1x32xf32>
    %7 = vector.broadcast %6 : vector<1x32xf32> to vector<24x32xf32>
    %8 = arith.addf %5, %7 : vector<24x32xf32>
    %9 = math.tanh %8 : vector<24x32xf32>
    %10 = arith.truncf %9 : vector<24x32xf32> to vector<24x32xbf16>
    %c0_7 = arith.constant 0 : index
    %c0_8 = arith.constant 0 : index
    %11 = vector.load %arg4[%c0_7, %c0_8] : memref<32x32xbf16, #tpu.memory_space<vmem>>, vector<32x32xbf16>
    %cst_9 = arith.constant dense<0.000000e+00> : vector<24x32xf32>
    %12 = tpu.matmul %10, %11, %cst_9 {dimension_numbers = #tpu.dot_dimension_numbers<[1], [0], [0], [1], [0, 0, 1, 1], [], []>} : vector<24x32xbf16>, vector<32x32xbf16>, vector<24x32xf32> -> vector<24x32xf32>
    %c0_10 = arith.constant 0 : index
    %c0_11 = arith.constant 0 : index
    %13 = vector.load %arg5[%c0_10, %c0_11] : memref<3x32xf32, #tpu.memory_space<vmem>>, vector<1x32xf32>
    %14 = vector.broadcast %13 : vector<1x32xf32> to vector<24x32xf32>
    %15 = arith.addf %12, %14 : vector<24x32xf32>
    %16 = math.tanh %15 : vector<24x32xf32>
    %c1 = arith.constant 1 : index
    %c0_12 = arith.constant 0 : index
    %17 = vector.load %arg5[%c1, %c0_12] : memref<3x32xf32, #tpu.memory_space<vmem>>, vector<1x32xf32>
    %18 = vector.broadcast %17 : vector<1x32xf32> to vector<24x32xf32>
    %19 = arith.mulf %16, %18 : vector<24x32xf32>
    %c2 = arith.constant 2 : index
    %c0_13 = arith.constant 0 : index
    %20 = vector.load %arg5[%c2, %c0_13] : memref<3x32xf32, #tpu.memory_space<vmem>>, vector<1x32xf32>
    %21 = vector.broadcast %20 : vector<1x32xf32> to vector<24x32xf32>
    %22 = arith.addf %19, %21 : vector<24x32xf32>
    %23 = vector.extract_strided_slice %22 {offsets = [0, 0], sizes = [8, 32], strides = [1, 1]} : vector<24x32xf32> to vector<8x32xf32>
    %24 = vector.extract_strided_slice %22 {offsets = [8, 0], sizes = [16, 32], strides = [1, 1]} : vector<24x32xf32> to vector<16x32xf32>
    %25 = arith.mulf %23, %23 : vector<8x32xf32>
    %cst_14 = arith.constant dense<0.000000e+00> : vector<8xf32>
    %26 = vector.multi_reduction <add>, %25, %cst_14 [1] : vector<8x32xf32> to vector<8xf32>
    %27 = vector.shape_cast %26 : vector<8xf32> to vector<8x1xf32>
    %28 = arith.mulf %24, %24 : vector<16x32xf32>
    %cst_15 = arith.constant dense<0.000000e+00> : vector<16xf32>
    %29 = vector.multi_reduction <add>, %28, %cst_15 [1] : vector<16x32xf32> to vector<16xf32>
    %30 = vector.shape_cast %29 : vector<16xf32> to vector<16x1xf32>
    %31 = arith.truncf %23 : vector<8x32xf32> to vector<8x32xbf16>
    %32 = arith.truncf %24 : vector<16x32xf32> to vector<16x32xbf16>
    %cst_16 = arith.constant dense<0.000000e+00> : vector<8x16xf32>
    %33 = tpu.matmul %31, %32, %cst_16 {dimension_numbers = #tpu.dot_dimension_numbers<[1], [1], [0], [0], [0, 0, 1, 0], [], []>} : vector<8x32xbf16>, vector<16x32xbf16>, vector<8x16xf32> -> vector<8x16xf32>
    %34 = tpu.transpose %30, [1, 0] : vector<16x1xf32> -> vector<1x16xf32>
    %35 = vector.broadcast %27 : vector<8x1xf32> to vector<8x16xf32>
    %36 = vector.broadcast %34 : vector<1x16xf32> to vector<8x16xf32>
    %37 = arith.addf %35, %36 : vector<8x16xf32>
    %cst_17 = arith.constant 2.000000e+00 : f32
    %38 = vector.broadcast %cst_17 : f32 to vector<8x16xf32>
    %39 = arith.mulf %38, %33 : vector<8x16xf32>
    %40 = arith.subf %37, %39 : vector<8x16xf32>
    %cst_18 = arith.constant 0.000000e+00 : f32
    %41 = vector.broadcast %cst_18 : f32 to vector<8x16xf32>
    %42 = arith.maximumf %40, %41 : vector<8x16xf32>
    %43 = math.sqrt %42 : vector<8x16xf32>
    %cst_19 = arith.constant 0.000000e+00 : f32
    %44 = vector.broadcast %cst_19 : f32 to vector<8x16xf32>
    %45 = arith.subf %44, %43 : vector<8x16xf32>
    %cst_20 = arith.constant dense<0xFF800000> : vector<8xf32>
    %46 = vector.multi_reduction <maximumf>, %45, %cst_20 [1] : vector<8x16xf32> to vector<8xf32>
    %47 = vector.shape_cast %46 : vector<8xf32> to vector<8x1xf32>
    %48 = vector.broadcast %47 : vector<8x1xf32> to vector<8x16xf32>
    %49 = arith.subf %45, %48 : vector<8x16xf32>
    %50 = math.exp %49 : vector<8x16xf32>
    %cst_21 = arith.constant dense<0.000000e+00> : vector<8xf32>
    %51 = vector.multi_reduction <add>, %50, %cst_21 [1] : vector<8x16xf32> to vector<8xf32>
    %52 = vector.shape_cast %51 : vector<8xf32> to vector<8x1xf32>
    %53 = vector.broadcast %52 : vector<8x1xf32> to vector<8x16xf32>
    %54 = arith.divf %50, %53 : vector<8x16xf32>
    %55 = arith.truncf %54 : vector<8x16xf32> to vector<8x16xbf16>
    %c0_22 = arith.constant 0 : index
    %c0_23 = arith.constant 0 : index
    %56 = vector.load %arg6[%c0_22, %c0_23] : memref<16x1xf32, #tpu.memory_space<vmem>>, vector<16x1xf32>
    %57 = arith.truncf %56 : vector<16x1xf32> to vector<16x1xbf16>
    %cst_24 = arith.constant dense<0.000000e+00> : vector<8x1xf32>
    %58 = tpu.matmul %55, %57, %cst_24 {dimension_numbers = #tpu.dot_dimension_numbers<[1], [0], [0], [1], [0, 0, 1, 1], [], []>} : vector<8x16xbf16>, vector<16x1xbf16>, vector<8x1xf32> -> vector<8x1xf32>
    %cst_25 = arith.constant 0.000000e+00 : f32
    %cst_26 = arith.constant 1.000000e+00 : f32
    %59 = vector.broadcast %cst_25 : f32 to vector<8x1xf32>
    %60 = arith.maximumf %59, %58 : vector<8x1xf32>
    %61 = vector.broadcast %cst_26 : f32 to vector<8x1xf32>
    %62 = arith.minimumf %61, %60 : vector<8x1xf32>
    %c0_27 = arith.constant 0 : index
    %c0_28 = arith.constant 0 : index
    %63 = vector.load %arg7[%c0_27, %c0_28] : memref<8x1xf32, #tpu.memory_space<vmem>>, vector<8x1xf32>
    tpu.vector_store %arg7[%c0_27, %c0_28], %62 {strides = array<i32>} : memref<8x1xf32, #tpu.memory_space<vmem>>, vector<8x1xf32>,
    return
  }
}

</mosaic_0001>

<bundles_post_ra>
// kernel: tpu_custom_call.1
= control target key start
LH: loop header
LB: loop body
LE: loop exit
PB: predicated region body
PF: predicated region fallthrough
CT: control target
= control target key end

     0   :  { %12 = vsyncpa [#allocation3], 0  ;;  %s730_s0 = inlined_call_operand.hbm [shape: f32[8,16], index: 0, kind: input, shape index: {}]   ;;  %s731_s1 = inlined_call_operand.vmem [shape: f32[16,16], index: 1, kind: input, shape index: {}]   ;;  %s732_s2 = inlined_call_operand.hbm [shape: bf16[16,32], index: 2, kind: input, shape index: {}]   ;;  %s733_s3 = inlined_call_operand.hbm [shape: f32[1,32], index: 3, kind: input, shape index: {}]   ;;  %s734_s4 = inlined_call_operand.vmem [shape: bf16[32,32], index: 4, kind: input, shape index: {}]   ;;  %s735_s5 = inlined_call_operand.hbm [shape: f32[3,32], index: 5, kind: input, shape index: {}]   ;;  %s736_s6 = inlined_call_operand.vmem [shape: f32[16,1], index: 6, kind: input, shape index: {}]   ;;  %s737_s7 = inlined_call_operand.vmem [shape: f32[8,1], index: 7, kind: output, shape index: {}]  }
   0x1   :  { %13 = vsyncpa [#allocation5], 0 }
   0x2   :  { %14 = vsyncpa [#allocation8], 0  ;;  %s601_s24 = smov [#allocation4]   ;;  %s507_s28 = scalar_lea.hbm %s732_s2, 128 }
   0x3   :  { %s32_s25 = sshll.u32 %s601_s24, 4  ;;  %p508_p0 = scmp.ne.s32.totalorder %s732_s2, %s507_s28  ;;  %s33_s25 = int_to_ptr.vmem [resolvable:$true] %s32_s25 }
   0x4   :  { %p511_p1 = scmp.lt.u32.totalorder %s507_s28, %s732_s2 }
   0x6   :  { %p513_p2 = pnand %p511_p1, %p508_p0 }
   0x8   :  { %516 = shalt.err (!%p513_p2)
}
   0x9   :  { %s517_s10 = scalar_lea.vmem %s33_s25, 128  ;;  %p522_p4 = scmp.lt.s32.totalorder %s33_s25, %s33_s25 }
   0xa   :  { %p518_p3 = scmp.ne.s32.totalorder %s33_s25, %s517_s10  ;;  %p523_p5 = scmp.lt.s32.totalorder %s517_s10, %s517_s10 }
   0xc   :  { %p524_p6 = por %p523_p5, %p522_p4 }
   0xe   :  { %p525_p7 = pnand %p524_p6, %p518_p3 }
  0x10   :  { %528 = shalt.err (!%p525_p7)
}
  0x11   :  { %s602_s11 = smov 64   ;;  %s603_s12 = smov 4  }
  0x12   :  { %38 = dma.hbm_to_vmem [thread:$0]  %s732_s2, 128, %s33_s25, [#allocation5], %s602_s11, %s602_s11, %s603_s12  }
  0x13   :  { %s604_s15 = smov [#allocation2]   ;;  %s605_s17 = smov [#allocation6]  }
  0x14   :  { %s21_s16 = sshll.u32 %s604_s15, 4  ;;  %s45_s18 = sshll.u32 %s605_s17, 4  ;;  %s22_s16 = int_to_ptr.vmem [resolvable:$true] %s21_s16  ;;  %s46_s18 = int_to_ptr.vmem [resolvable:$true] %s45_s18 }
  0x15   :  { %s529_s21 = scalar_lea.hbm %s730_s0, 128 }
  0x16   :  { %p530_p8 = scmp.ne.s32.totalorder %s730_s0, %s529_s21  ;;  %p533_p9 = scmp.lt.u32.totalorder %s529_s21, %s730_s0 }
  0x18   :  { %p535_p10 = pnand %p533_p9, %p530_p8 }
  0x1a   :  { %538 = shalt.err (!%p535_p10)
}
  0x1b   :  { %s539_s2 = scalar_lea.vmem %s22_s16, 128  ;;  %p544_p12 = scmp.lt.s32.totalorder %s22_s16, %s22_s16 }
  0x1c   :  { %p540_p11 = scmp.ne.s32.totalorder %s22_s16, %s539_s2  ;;  %p545_p13 = scmp.lt.s32.totalorder %s539_s2, %s539_s2 }
  0x1e   :  { %p546_p0 = por %p545_p13, %p544_p12 }
  0x20   :  { %p547_p1 = pnand %p546_p0, %p540_p11 }
  0x22   :  { %550 = shalt.err (!%p547_p1)
}
  0x23   :  { %24 = dma.hbm_to_vmem [thread:$0]  %s730_s0, 128, %s22_s16, [#allocation3]  }
  0x24   :  { %s551_s30 = scalar_lea.hbm %s733_s3, 16 }
  0x25   :  { %p552_p2 = scmp.ne.s32.totalorder %s733_s3, %s551_s30  ;;  %p555_p3 = scmp.lt.u32.totalorder %s551_s30, %s733_s3 }
  0x27   :  { %p557_p4 = pnand %p555_p3, %p552_p2 }
  0x29   :  { %560 = shalt.err (!%p557_p4)
}
  0x2a   :  { %s561_s12 = scalar_lea.vmem %s46_s18, 16  ;;  %s565_s13 = scalar_lea.vmem %s46_s18, 32 }
  0x2b   :  { %p562_p5 = scmp.ne.s32.totalorder %s46_s18, %s561_s12  ;;  %p566_p6 = scmp.lt.s32.totalorder %s46_s18, %s46_s18 }
  0x2c   :  { %p567_p7 = scmp.lt.s32.totalorder %s565_s13, %s561_s12 }
  0x2e   :  { %p568_p8 = por %p567_p7, %p566_p6 }
  0x30   :  { %p569_p9 = pnand %p568_p8, %p562_p5 }
  0x32   :  { %572 = shalt.err (!%p569_p9)
}
  0x33   :  { %48 = dma.hbm_to_vmem [thread:$0]  %s733_s3, 16, %s46_s18, [#allocation5]  }
  0x34   :  { %s606_s15 = smov [#allocation7]   ;;  %s573_s20 = scalar_lea.hbm %s735_s5, 64 }
  0x35   :  { %s57_s16 = sshll.u32 %s606_s15, 4  ;;  %p574_p10 = scmp.ne.s32.totalorder %s735_s5, %s573_s20  ;;  %s58_s16 = int_to_ptr.vmem [resolvable:$true] %s57_s16 }
  0x36   :  { %p577_p11 = scmp.lt.u32.totalorder %s573_s20, %s735_s5 }
  0x38   :  { %p579_p12 = pnand %p577_p11, %p574_p10 }
  0x3a   :  { %582 = shalt.err (!%p579_p12)
}
  0x3b   :  { %s583_s26 = scalar_lea.vmem %s58_s16, 64  ;;  %p588_p0 = scmp.lt.s32.totalorder %s58_s16, %s58_s16 }
  0x3c   :  { %p584_p13 = scmp.ne.s32.totalorder %s58_s16, %s583_s26  ;;  %p589_p1 = scmp.lt.s32.totalorder %s583_s26, %s583_s26 }
  0x3e   :  { %p590_p2 = por %p589_p1, %p588_p0 }
  0x40   :  { %p591_p3 = pnand %p590_p2, %p584_p13 }
  0x42   :  { %594 = shalt.err (!%p591_p3)
}
  0x43   :  { %60 = dma.hbm_to_vmem [thread:$0]  %s735_s5, 64, %s58_s16, [#allocation8]  }
  0x44   :  { %595 = dma.done.wait [#allocation3], 128  }
  0x45   :  { %596 = vsyncadd [#allocation3], 4294967168 }
  0x46   :  { %597 = dma.done.wait [#allocation5], 144  }
  0x47   :  { %598 = vsyncadd [#allocation5], 4294967152 }
  0x48   :  { %599 = dma.done.wait [#allocation8], 64  }
  0x49   :  { %600 = vsyncadd [#allocation8], 4294967232  ;;  %v486_v0 = vld [vmem:[#allocation4] sm:$0xff]   ;;  %v76_v1 = vld [vmem:[#allocation2] sm:$0xff]  ;;  %vm96_vm0 = vcmask 130048   ;;  %vm177_vm1 = vcmask 261120   ;;  %v343_v56 = vlaneseq }
  0x4a   :  { %v77_v2 = vld [vmem:[%s731_s1] sm:$0xff]  ;;  %v78_v3 = vld [vmem:[%s731_s1 + $0x8] sm:$0xff]  ;;  %452 = vmatprep.subr.bf16.mxu0 %v486_v0  ;;  %v428_v8 = vld [vmem:[#allocation6] ss:$0 sm:$0xff]  ;;  %v607_v21 = vmov 0.0   ;;  %vm608_vm2 = vmmov 0  }
  0x4b   :  { %v79_v4 = vpack.c.bf16 %v77_v2, %v76_v1  ;;  %v80_v5 = vpack.c.bf16 %v78_v3, %v78_v3  ;;  %453 = vmatpush3.bf16.msra.mxu0 %v486_v0  ;;  %v487_v6 = vld [vmem:[%s734_s4] sm:$0xff]   ;;  %v488_v7 = vld [vmem:[%s734_s4 + $0x8] sm:$0xff]   ;;  %v432_v22 = vld [vmem:[#allocation7] ss:$0 sm:$0xff]  ;;  %v344_v57 = vshrl.u32 %v343_v56, 7  ;;  %vm419_vm5 = vcmask 7168  }
  0x4c   :  { %458 = vmatprep.subr.bf16.mxu1 %v487_v6  ;;  %466 = vmatprep.subr.bf16.mxu0 %v607_v21  ;;  %v437_v30 = vld [vmem:[#allocation7 + $0x1] ss:$0 sm:$0xff]  ;;  %v438_v33 = vld [vmem:[#allocation7 + $0x2] ss:$0 sm:$0xff] }
  0x4d   :  { %454 = vmatprep.mubr.msk.bf16.mxu0 %vm96_vm0, %v79_v4  ;;  %459 = vmatpush3.bf16.msra.mxu1 %v487_v6  ;;  %v345_v59 = vsub.s32 0, %v344_v57 }
  0x4e   :  { %455 = vmatmul.mubr.msk.bf16.vlgmr.msra.gmra.mrb[0].mxu0 %vm96_vm0, %v80_v5  ;;  %460 = vmatprep.subr.bf16.mxu1 %v488_v7 }
  0x4f   :  { %468 = vmatprep.mubr.msk.bf16.mxu0 %vm608_vm2, %v607_v21 }
  0x51   :  { %461 = vmatpush3.bf16.msra.mxu1 %v488_v7 }
  0x52   :  { %472 = vmatprep.subr.bf16.mxu1 %v607_v21 }
 0x121   :  { %v456_v9 = vpop.f32.mrb[0].mxu0 }
 0x122   :  { %v146_v10 = vadd.f32 %v456_v9, %v428_v8  ;;  %v137_v11 = vpop.f32.mrb[1].mxu0 }
 0x123   :  { %v138_v12 = vadd.f32 %v428_v8, %v137_v11  ;;  %v457_v13 = vpop.f32.mrb[2].mxu0 }
 0x124   :  { %v140_v14 = vpop.f32.mrb[3].mxu0  ;;  %489 = vtanh.f32 %v146_v10 }
 0x125   :  { %v141_v15 = vadd.f32 %v428_v8, %v140_v14  ;;  %491 = vtanh.f32 %v138_v12  ;;  %v371_v14 = vld [vmem:[%s736_s6] sm:$0xff] }
 0x127   :  { %493 = vtanh.f32 %v141_v15  ;;  %v372_v15 = vld [vmem:[%s736_s6 + $0x8] sm:$0xff] }
 0x12e   :  { %v490_v16 = vpop.eup %489 }
 0x12f   :  { %v492_v17 = vpop.eup %491  ;;  %v155_v20 = vpack.c.bf16 %v490_v16, %v490_v16  ;;  %v373_v16 = vpack.c.bf16 %v372_v15, %v371_v14 }
 0x131   :  { %v494_v18 = vpop.eup %493 }
 0x132   :  { %v154_v19 = vpack.c.bf16 %v494_v18, %v492_v17 }
 0x134   :  { %462 = vmatprep.mubr.msk.bf16.mxu1 %vm177_vm1, %v154_v19 }
 0x135   :  { %463 = vmatmul.mubr.msk.bf16.vlgmr.msra.gmra.mrb[0].mxu1 %vm177_vm1, %v155_v20 }
 0x136   :  { %474 = vmatprep.mubr.msk.bf16.mxu1 %vm608_vm2, %v607_v21  ;;  %473 = vmatpush3.bf16.msra.mxu1 %v373_v16 }
 0x208   :  { %v464_v23 = vpop.f32.mrb[0].mxu1 }
 0x209   :  { %v227_v24 = vadd.f32 %v464_v23, %v432_v22  ;;  %v218_v25 = vpop.f32.mrb[1].mxu1 }
 0x20a   :  { %v219_v26 = vadd.f32 %v432_v22, %v218_v25  ;;  %v465_v27 = vpop.f32.mrb[2].mxu1 }
 0x20b   :  { %495 = vtanh.f32 %v227_v24  ;;  %v221_v28 = vpop.f32.mrb[3].mxu1 }
 0x20c   :  { %497 = vtanh.f32 %v219_v26  ;;  %v222_v29 = vadd.f32 %v432_v22, %v221_v28 }
 0x20e   :  { %499 = vtanh.f32 %v222_v29 }
 0x215   :  { %v496_v31 = vpop.eup %495 }
 0x216   :  { %v498_v32 = vpop.eup %497  ;;  %v242_v35 = vmul.f32 %v496_v31, %v437_v30 }
 0x217   :  { %v240_v34 = vmul.f32 %v498_v32, %v437_v30 }
 0x218   :  { %v500_v36 = vpop.eup %499  ;;  %v250_v41 = vadd.f32 %v438_v33, %v242_v35 }
 0x219   :  { %v248_v37 = vadd.f32 %v438_v33, %v240_v34  ;;  %v241_v38 = vmul.f32 %v500_v36, %v437_v30 }
 0x21a   :  { %v256_v47 = vmul.f32 %v250_v41, %v250_v41 }
 0x21b   :  { %v251_v39 = vmul.f32 %v248_v37, %v248_v37  ;;  %v249_v40 = vadd.f32 %v438_v33, %v241_v38  ;;  %v263_v49 = vpack.c.bf16 %v248_v37, %v248_v37 }
 0x21c   :  { %v260_v48 = vsel %vm177_vm1, %v256_v47, 0.0 }
 0x21d   :  { %v252_v42 = vsel %vm177_vm1, %v251_v39, 0.0  ;;  %v264_v43 = vpack.c.bf16 %v250_v41, %v249_v40  ;;  %v255_v44 = vmul.f32 %v249_v40, %v249_v40 }
 0x21e   :  { %253 = vadd.xlane.f32.xlu1 %v252_v42 }
 0x21f   :  { %v269_v45 = vsel %vm177_vm1, %v264_v43, 0  ;;  %v257_v46 = vsel %vm177_vm1, %v255_v44, 0.0 }
 0x220   :  { %467 = vmatpush3.bf16.xpose.msra.mxu0 %v269_v45  ;;  %258 = vadd.xlane.f32.xlu0 %v257_v46 }
 0x224   :  { %261 = vadd.xlane.f32.xlu0 %v260_v48 }
 0x227   :  { %469 = vmatmul.mubr.msk.bf16.vlgmr.msra.gmra.mrb[4].mxu0 %vm177_vm1, %v263_v49 }
 0x2ab   :  { %v254_v58 = vpop.xlane.xlu1 %253 }
 0x2ad   :  { %v259_v50 = vpop.xlane.xlu0 %258 }
 0x2ae   :  { %311 = vxpose.xlu1.b32.start [1/2] (short) (narrow) %v259_v50, 8 }
 0x2b1   :  { %v262_v51 = vpop.xlane.xlu0 %261 }
 0x2b2   :  { %312 = vxpose.xlu1.b32.end [2/2] (short) (narrow) %v262_v51, 8 }
 0x2fa   :  { %v305_v52 = vpop.f32.mrb[4].mxu0 }
 0x2fb   :  { %v470_v53 = vpop.f32.mrb[5].mxu0  ;;  %v348_v62 = vmul.f32 2.0, %v305_v52 }
 0x2fc   :  { %v308_v54 = vpop.f32.mrb[6].mxu0 }
 0x2fd   :  { %v471_v55 = vpop.f32.mrb[7].mxu0 }
 0x32e   :  { %v327_v60 = vpop.trf.xlu1 }
 0x32f   :  { %v346_v61 = vrot.slane %v327_v60, %v345_v59 }
 0x331   :  { %v347_v63 = vadd.f32 %v346_v61, %v254_v58 }
 0x333   :  { %v349_v0 = vsub.f32 %v347_v63, %v348_v62 }
 0x335   :  { %v350_v1 = vmax.f32 %v349_v0, 0.0 }
 0x337   :  { %501 = vrsqrt.f32 %v350_v1  ;;  %vm353_vm3 = vcmp.eq.f32.partialorder %v350_v1, inf  ;;  %v356_v4 = vand.u32 2147483648, %v350_v1  ;;  %vm355_vm4 = vcmp.eq.f32.partialorder %v350_v1, 0.0 }
 0x341   :  { %v502_v2 = vpop.eup %501 }
 0x342   :  { %v352_v3 = vmul.f32 %v502_v2, %v350_v1 }
 0x344   :  { %v354_v5 = vsel %vm353_vm3, %v350_v1, %v352_v3 }
 0x345   :  { %v357_v6 = vsel %vm355_vm4, %v356_v4, %v354_v5 }
 0x346   :  { %v358_v7 = vsub.f32 0.0, %v357_v6 }
 0x348   :  { %v359_v8 = vsel %vm96_vm0, %v358_v7, -inf }
 0x349   :  { %360 = vmax.xlane.f32.xlu0 %v359_v8 }
 0x3d6   :  { %v361_v9 = vpop.xlane.xlu0 %360 }
 0x3d7   :  { %v362_v10 = vsub.f32 %v358_v7, %v361_v9 }
 0x3d9   :  { %v363_v11 = vmul.f32 1.442695, %v362_v10 }
 0x3db   :  { %503 = vpow2.f32 %v363_v11 }
 0x3e5   :  { %v504_v12 = vpop.eup %503 }
 0x3e6   :  { %v365_v13 = vsel %vm96_vm0, %v504_v12, 0.0 }
 0x3e7   :  { %366 = vadd.xlane.f32.xlu0 %v365_v13 }
 0x474   :  { %v367_v17 = vpop.xlane.xlu0 %366 }
 0x475   :  { %505 = vrcp.f32 %v367_v17 }
 0x47f   :  { %v506_v18 = vpop.eup %505 }
 0x480   :  { %v369_v19 = vmul.f32 %v506_v18, %v504_v12 }
 0x482   :  { %v370_v20 = vpack.c.bf16 %v369_v19, %v369_v19 }
 0x484   :  { %475 = vmatmul.mubr.msk.bf16.vlgmr.msra.gmra.mrb[4].mxu1 %vm96_vm0, %v370_v20 }
 0x557   :  { %v411_v21 = vpop.f32.mrb[4].mxu1 }
 0x558   :  { %v417_v22 = vmax.f32 %v411_v21, 0.0  ;;  %v476_v23 = vpop.f32.mrb[5].mxu1 }
 0x559   :  { %v414_v24 = vpop.f32.mrb[6].mxu1 }
 0x55a   :  { %v418_v25 = vmin.f32 %v417_v22, 1.0  ;;  %v477_v26 = vpop.f32.mrb[7].mxu1 }
 0x55c   :  { %420 = vst.msk [vmem:[%s737_s7] sm:$0xff] %vm419_vm5, %v418_v25 }
 0x55d   :  { %425 = vsyncpa [#allocation3], 1 }
 0x55e   :  { %426 = vsyncpa [#allocation5], 1 }
 0x55f   :  { %427 = vsyncpa [#allocation8], 1 }

</bundles_post_ra>
